<compile_context>
chip_gen: v7x
topology: tpu7x:2x2x1
jax: 0.10.0
libtpu: 0.0.40
codegen_flags: <defaults>
</compile_context>

<pallas_src>
import functools

import jax
import jax.numpy as jnp
from jax.experimental import pallas as pl
from jax.experimental.pallas import tpu as pltpu


def _round_up(n, m):
    return ((n + m - 1) // m) * m


# ----------------------------------------------------------------------------
# Fused Pallas kernel: x -> [ (x @ W_i + b_i) -> act_i ] for all layers
# ----------------------------------------------------------------------------
def _apply_activation(y, activation):
    # y is f32 (MXU accumulator dtype); keep activation math in f32.
    if activation == "linear":
        return y
    if activation == "relu":
        return jnp.maximum(y, 0.0)
    if activation == "sigmoid":
        # exp and approx reciprocal both run in the (otherwise idle) EUP slot.
        return pl.reciprocal(1.0 + jnp.exp(-y), approx=True)
    if activation == "tanh":
        return jnp.tanh(y)
    if activation == "elu":
        # expm1 on the clamped value avoids inf in the discarded branch.
        return jnp.where(y > 0, y, jnp.expm1(jnp.minimum(y, 0.0)))
    # TODO(synk): 'rrelu' (stochastic in train mode) and 'param_relu' /
    # 'param_sigmoid' (learned-parameter activations) are not exercised by
    # this config and have no clean static Pallas equivalent here.
    raise NotImplementedError(activation)


def _decoder_fused_kernel(*refs, activations, compute_dtype):
    # refs layout: x_ref, (w1, b1), (w2, b2), ..., o_ref
    n = len(activations)
    x_ref = refs[0]
    o_ref = refs[1 + 2 * n]

    h = x_ref[...]                                    # bf16 tile (TB, D0_pad)
    for i in range(n):
        w_ref = refs[1 + 2 * i]                       # (Din_pad, Dout_pad) bf16
        b_ref = refs[2 + 2 * i]                       # (1, Dout_pad)       f32
        y = jnp.dot(h, w_ref[...], preferred_element_type=jnp.float32)
        y = y + b_ref[...]                            # broadcast over batch
        y = _apply_activation(y, activations[i])
        if i + 1 < n:
            h = y.astype(compute_dtype)               # feed MXU in bf16 again
        else:
            h = y
    o_ref[...] = h.astype(o_ref.dtype)


# ----------------------------------------------------------------------------
# JAX wrapper: padding, (optional) batch grid, cost estimate
# ----------------------------------------------------------------------------
def decoder_forward(x, params_padded, activations, in_dim, out_dim,
                    compute_dtype=jnp.bfloat16, tb_max=512):
    """x: (B, in_dim) -> (B, out_dim) through the fused decoder kernel."""
    B, code = x.shape
    assert code == in_dim, (code, in_dim)

    d0_pad = params_padded[0][0].shape[0]
    dn_pad = params_padded[-1][0].shape[1]

    # Batch tiling: pad to a multiple of 8 sublanes; tile at most tb_max rows.
    b8 = _round_up(B, 8)
    tb = min(tb_max, b8)
    b_pad = _round_up(b8, tb)
    num_tiles = b_pad // tb

    # Zero-pad activations into the lane-dense layout once, in the wrapper.
    x_pad = jnp.zeros((b_pad, d0_pad), compute_dtype)
    x_pad = x_pad.at[:B, :code].set(x.astype(compute_dtype))

    flat_params = []
    for w, b in params_padded:
        flat_params.extend((w, b))

    kernel = functools.partial(
        _decoder_fused_kernel,
        activations=tuple(activations),
        compute_dtype=compute_dtype,
    )

    # Advisory cost estimate (tiny kernel -> let XLA overlap it freely).
    flops = 2 * b_pad * sum(int(w.shape[0]) * int(w.shape[1])
                            for w, _ in params_padded)
    transcendentals = b_pad * dn_pad
    bytes_accessed = (
        x_pad.size * x_pad.dtype.itemsize
        + sum(w.size * w.dtype.itemsize + b.size * b.dtype.itemsize
              for w, b in params_padded)
        + b_pad * dn_pad * 4
    )
    cost = pl.CostEstimate(flops=flops, transcendentals=transcendentals,
                           bytes_accessed=bytes_accessed)

    out_shape = jax.ShapeDtypeStruct((b_pad, dn_pad), jnp.float32)
    n_in = 1 + len(flat_params)

    if num_tiles == 1:
        # Single block: no grid, no pipeline prologue. Whole arrays in VMEM.
        out = pl.pallas_call(
            kernel,
            out_shape=out_shape,
            in_specs=[pl.BlockSpec(memory_space=pltpu.MemorySpace.VMEM)] * n_in,
            out_specs=pl.BlockSpec(memory_space=pltpu.MemorySpace.VMEM),
            compiler_params=pltpu.CompilerParams(
                # keep explicit headroom (v7x has only 64 MiB physical VMEM)
                vmem_limit_bytes=32 * 1024 * 1024,
            ),
            cost_estimate=cost,
        )(x_pad, *flat_params)
    else:
        # Batch grid: activations tiled, weights/biases resident across steps.
        in_specs = [pl.BlockSpec((tb, d0_pad), lambda i: (i, 0))]
        for w, b in params_padded:
            in_specs.append(pl.BlockSpec(w.shape, lambda i: (0, 0)))
            in_specs.append(pl.BlockSpec(b.shape, lambda i: (0, 0)))
        out_specs = pl.BlockSpec((tb, dn_pad), lambda i: (i, 0))
        out = pl.pallas_call(
            kernel,
            out_shape=out_shape,
            grid_spec=pl.GridSpec(
                grid=(num_tiles,),
                in_specs=in_specs,
                out_specs=out_specs,
            ),
            compiler_params=pltpu.CompilerParams(
                dimension_semantics=("parallel",),   # shard across TCs on v7x
                vmem_limit_bytes=32 * 1024 * 1024,
            ),
            cost_estimate=cost,
        )(x_pad, *flat_params)

    return out[:B, :out_dim]


# ----------------------------------------------------------------------------
# Decoder module (plain-JAX parameter construction around the Pallas kernel)
# ----------------------------------------------------------------------------
class Decoder:
    def __init__(self, resolution, hidden_layers, act_hid, act_out, key,
                 compute_dtype=jnp.bfloat16):
        # layers = [res_h*res_w] + hidden_layers (encoder ordering)
        self.layers = [resolution[0] * resolution[1]] + list(hidden_layers)
        self.steps = len(self.layers) - 1
        self.act_hid = act_hid
        self.act_out = act_out
        self.compute_dtype = compute_dtype

        # Decoder linears: layers[steps-k] -> layers[steps-k-1], then -> layers[0]
        dims = []
        for k in range(self.steps - 1):
            dims.append((self.layers[self.steps - k],
                         self.layers[self.steps - k - 1]))
        dims.append((self.layers[1], self.layers[0]))
        self.dims = dims
        self.in_dim = dims[0][0]
        self.out_dim = dims[-1][1]
        self.activations = [self.act_hid] * (len(dims) - 1) + [self.act_out]

        self.params_f32 = []      # exact f32 params (for reference / export)
        self.params_padded = []   # lane-dense (x128) bf16 weights, f32 biases
        for din, dout in dims:
            key, sub = jax.random.split(key)
            # xavier_normal_: std = sqrt(2 / (fan_in + fan_out)); bias = 0.
            std = (2.0 / (din + dout)) ** 0.5
            # PyTorch weight is (dout, din); store pre-transposed as (din, dout).
            w = std * jax.random.normal(sub, (din, dout), dtype=jnp.float32)
            b = jnp.zeros((dout,), dtype=jnp.float32)
            self.params_f32.append((w, b))

            din_p = _round_up(din, 128)
            dout_p = _round_up(dout, 128)
            w_p = jnp.zeros((din_p, dout_p), jnp.float32)
            w_p = w_p.at[:din, :dout].set(w).astype(compute_dtype)
            b_p = jnp.zeros((1, dout_p), jnp.float32).at[0, :dout].set(b)
            self.params_padded.append((w_p, b_p))

    def __call__(self, x):
        # nn.Flatten with 'linear' activation: (B, code) -> (B, code).
        x = x.reshape(x.shape[0], -1)
        return decoder_forward(x, self.params_padded, self.activations,
                               self.in_dim, self.out_dim, self.compute_dtype)


# ----------------------------------------------------------------------------
def _reference(dec, x):
    """Pure-jnp f32 reference of the same forward for a sanity check."""
    y = x.reshape(x.shape[0], -1).astype(jnp.float32)
    for (w, b), act in zip(dec.params_f32, dec.activations):
        y = y @ w + b
        if act == "relu":
            y = jnp.maximum(y, 0.0)
        elif act == "sigmoid":
            y = jax.nn.sigmoid(y)
        elif act == "tanh":
            y = jnp.tanh(y)
        elif act == "elu":
            y = jnp.where(y > 0, y, jnp.expm1(y))
        elif act == "linear":
            pass
    return y


if __name__ == "__main__":
    key = jax.random.PRNGKey(0)
    k_param, k_in1, k_in2 = jax.random.split(key, 3)

    resolution = (8, 8)          # -> output dim 64
    hidden_layers = [32, 8]      # code dim = 8

    dec = Decoder(resolution, hidden_layers, act_hid="relu",
                  act_out="sigmoid", key=k_param)
    code_dim = dec.layers[-1]
    out_dim = resolution[0] * resolution[1]

    # Case 1: tiny batch (no-grid single-block path).
    batch = 4
    x = jax.random.normal(k_in1, (batch, code_dim), dtype=jnp.float32)
    out = dec(x)
    jax.block_until_ready(out)
    ref = _reference(dec, x)
    assert out.shape == (batch, out_dim)
    assert jnp.allclose(out, ref, atol=1e-2, rtol=1e-2), "mismatch (small batch)"

    # Case 2: larger batch (batch-gridded path, weights VMEM-resident).
    batch2 = 520
    x2 = jax.random.normal(k_in2, (batch2, code_dim), dtype=jnp.float32)
    out2 = dec(x2)
    jax.block_until_ready(out2)
    ref2 = _reference(dec, x2)
    assert out2.shape == (batch2, out_dim)
    assert jnp.allclose(out2, ref2, atol=1e-2, rtol=1e-2), "mismatch (large batch)"

    print("KERNEL_OK")
</pallas_src>

<mosaic_0001>
module attributes {stable_mosaic.version = 11 : i64} {
  func.func @_decoder_fused_kernel(%arg0: memref<8x128xbf16, #tpu.memory_space<vmem>>, %arg1: memref<128x128xbf16, #tpu.memory_space<vmem>>, %arg2: memref<1x128xf32, #tpu.memory_space<vmem>>, %arg3: memref<128x128xbf16, #tpu.memory_space<vmem>>, %arg4: memref<1x128xf32, #tpu.memory_space<vmem>>, %arg5: memref<8x128xf32, #tpu.memory_space<vmem>>) attributes {dimension_semantics = [], scalar_prefetch = 0 : i64, scratch_operands = 0 : i64, tpu.core_type = #tpu.core_type<tc>} {
    %c0 = arith.constant 0 : index
    %c0_0 = arith.constant 0 : index
    %0 = vector.load %arg0[%c0, %c0_0] : memref<8x128xbf16, #tpu.memory_space<vmem>>, vector<8x128xbf16>
    %c0_1 = arith.constant 0 : index
    %c0_2 = arith.constant 0 : index
    %1 = vector.load %arg1[%c0_1, %c0_2] : memref<128x128xbf16, #tpu.memory_space<vmem>>, vector<128x128xbf16>
    %cst = arith.constant dense<0.000000e+00> : vector<8x128xf32>
    %2 = tpu.matmul %0, %1, %cst {dimension_numbers = #tpu.dot_dimension_numbers<[1], [0], [0], [1], [0, 0, 1, 1], [], []>} : vector<8x128xbf16>, vector<128x128xbf16>, vector<8x128xf32> -> vector<8x128xf32>
    %c0_3 = arith.constant 0 : index
    %c0_4 = arith.constant 0 : index
    %3 = vector.load %arg2[%c0_3, %c0_4] : memref<1x128xf32, #tpu.memory_space<vmem>>, vector<1x128xf32>
    %4 = vector.broadcast %3 : vector<1x128xf32> to vector<8x128xf32>
    %5 = arith.addf %2, %4 : vector<8x128xf32>
    %cst_5 = arith.constant 0.000000e+00 : f32
    %6 = vector.broadcast %cst_5 : f32 to vector<8x128xf32>
    %7 = arith.maximumf %5, %6 : vector<8x128xf32>
    %8 = arith.truncf %7 : vector<8x128xf32> to vector<8x128xbf16>
    %c0_6 = arith.constant 0 : index
    %c0_7 = arith.constant 0 : index
    %9 = vector.load %arg3[%c0_6, %c0_7] : memref<128x128xbf16, #tpu.memory_space<vmem>>, vector<128x128xbf16>
    %cst_8 = arith.constant dense<0.000000e+00> : vector<8x128xf32>
    %10 = tpu.matmul %8, %9, %cst_8 {dimension_numbers = #tpu.dot_dimension_numbers<[1], [0], [0], [1], [0, 0, 1, 1], [], []>} : vector<8x128xbf16>, vector<128x128xbf16>, vector<8x128xf32> -> vector<8x128xf32>
    %c0_9 = arith.constant 0 : index
    %c0_10 = arith.constant 0 : index
    %11 = vector.load %arg4[%c0_9, %c0_10] : memref<1x128xf32, #tpu.memory_space<vmem>>, vector<1x128xf32>
    %12 = vector.broadcast %11 : vector<1x128xf32> to vector<8x128xf32>
    %13 = arith.addf %10, %12 : vector<8x128xf32>
    %cst_11 = arith.constant 0.000000e+00 : f32
    %14 = vector.broadcast %cst_11 : f32 to vector<8x128xf32>
    %15 = arith.subf %14, %13 : vector<8x128xf32>
    %16 = math.exp %15 : vector<8x128xf32>
    %cst_12 = arith.constant 1.000000e+00 : f32
    %17 = vector.broadcast %cst_12 : f32 to vector<8x128xf32>
    %18 = arith.addf %17, %16 : vector<8x128xf32>
    %19 = tpu.reciprocal %18 {approx = true} : vector<8x128xf32> -> vector<8x128xf32>
    %c0_13 = arith.constant 0 : index
    %c0_14 = arith.constant 0 : index
    %20 = vector.load %arg5[%c0_13, %c0_14] : memref<8x128xf32, #tpu.memory_space<vmem>>, vector<8x128xf32>
    tpu.vector_store %arg5[%c0_13, %c0_14], %19 {strides = array<i32>} : memref<8x128xf32, #tpu.memory_space<vmem>>, vector<8x128xf32>,
    return
  }
}

</mosaic_0001>

<bundles_post_ra>
// kernel: tpu_custom_call.1
= control target key start
LH: loop header
LB: loop body
LE: loop exit
PB: predicated region body
PF: predicated region fallthrough
CT: control target
= control target key end

     0   :  { %10 = vsyncpa [#allocation3], 0  ;;  %s604_s0 = inlined_call_operand.hbm [shape: bf16[8,128], index: 0, kind: input, shape index: {}]   ;;  %s605_s1 = inlined_call_operand.hbm [shape: bf16[128,128], index: 1, kind: input, shape index: {}]   ;;  %s606_s2 = inlined_call_operand.vmem [shape: f32[1,128], index: 2, kind: input, shape index: {}]   ;;  %s607_s3 = inlined_call_operand.hbm [shape: bf16[128,128], index: 3, kind: input, shape index: {}]   ;;  %s608_s4 = inlined_call_operand.vmem [shape: f32[1,128], index: 4, kind: input, shape index: {}]   ;;  %s609_s5 = inlined_call_operand.hbm [shape: f32[8,128], index: 5, kind: output, shape index: {}]  }
   0x1   :  { %11 = vsyncpa [#allocation6], 0 }
   0x2   :  { %12 = vsyncpa [#allocation4], 0  ;;  %s506_s18 = smov [#allocation5]   ;;  %s412_s22 = scalar_lea.hbm %s605_s1, 1024 }
   0x3   :  { %s28_s19 = sshll.u32 %s506_s18, 4  ;;  %p413_p0 = scmp.ne.s32.totalorder %s605_s1, %s412_s22  ;;  %s29_s19 = int_to_ptr.vmem [resolvable:$true] %s28_s19 }
   0x4   :  { %p416_p1 = scmp.lt.u32.totalorder %s412_s22, %s605_s1 }
   0x6   :  { %p418_p2 = pnand %p416_p1, %p413_p0 }
   0x8   :  { %421 = shalt.err (!%p418_p2)
}
   0x9   :  { %s422_s27 = scalar_lea.vmem %s29_s19, 1024  ;;  %p427_p4 = scmp.lt.s32.totalorder %s29_s19, %s29_s19 }
   0xa   :  { %p423_p3 = scmp.ne.s32.totalorder %s29_s19, %s422_s27  ;;  %p428_p5 = scmp.lt.s32.totalorder %s422_s27, %s422_s27 }
   0xc   :  { %p429_p6 = por %p428_p5, %p427_p4 }
   0xe   :  { %p430_p7 = pnand %p429_p6, %p423_p3 }
  0x10   :  { %433 = shalt.err (!%p430_p7)
}
  0x11   :  { %s507_s28 = smov 64   ;;  %s508_s29 = smov 4  }
  0x12   :  { %34 = dma.hbm_to_vmem [thread:$0]  %s605_s1, 1024, %s29_s19, [#allocation6], %s507_s28, %s507_s28, %s508_s29  }
  0x13   :  { %s509_s7 = smov [#allocation2]   ;;  %s510_s9 = smov [#allocation7]  }
  0x14   :  { %s19_s8 = sshll.u32 %s509_s7, 4  ;;  %s42_s10 = sshll.u32 %s510_s9, 4  ;;  %s20_s8 = int_to_ptr.vmem [resolvable:$true] %s19_s8  ;;  %s43_s10 = int_to_ptr.vmem [resolvable:$true] %s42_s10 }
  0x15   :  { %s434_s13 = scalar_lea.hbm %s604_s0, 64 }
  0x16   :  { %p435_p8 = scmp.ne.s32.totalorder %s604_s0, %s434_s13  ;;  %p438_p9 = scmp.lt.u32.totalorder %s434_s13, %s604_s0 }
  0x18   :  { %p440_p10 = pnand %p438_p9, %p435_p8 }
  0x1a   :  { %443 = shalt.err (!%p440_p10)
}
  0x1b   :  { %s444_s1 = scalar_lea.vmem %s20_s8, 64  ;;  %p449_p12 = scmp.lt.s32.totalorder %s20_s8, %s20_s8 }
  0x1c   :  { %p445_p11 = scmp.ne.s32.totalorder %s20_s8, %s444_s1  ;;  %p450_p13 = scmp.lt.s32.totalorder %s444_s1, %s444_s1 }
  0x1e   :  { %p451_p0 = por %p450_p13, %p449_p12 }
  0x20   :  { %p452_p1 = pnand %p451_p0, %p445_p11 }
  0x22   :  { %455 = shalt.err (!%p452_p1)
}
  0x23   :  { %22 = dma.hbm_to_vmem [thread:$0]  %s604_s0, 64, %s20_s8, [#allocation3]  }
  0x24   :  { %s456_s22 = scalar_lea.hbm %s607_s3, 1024 }
  0x25   :  { %p457_p2 = scmp.ne.s32.totalorder %s607_s3, %s456_s22  ;;  %p460_p3 = scmp.lt.u32.totalorder %s456_s22, %s607_s3 }
  0x27   :  { %p462_p4 = pnand %p460_p3, %p457_p2 }
  0x29   :  { %465 = shalt.err (!%p462_p4)
}
  0x2a   :  { %s466_s27 = scalar_lea.vmem %s43_s10, 1024  ;;  %p471_p6 = scmp.lt.s32.totalorder %s43_s10, %s43_s10 }
  0x2b   :  { %p467_p5 = scmp.ne.s32.totalorder %s43_s10, %s466_s27  ;;  %p472_p7 = scmp.lt.s32.totalorder %s466_s27, %s466_s27 }
  0x2d   :  { %p473_p8 = por %p472_p7, %p471_p6 }
  0x2f   :  { %p474_p9 = pnand %p473_p8, %p467_p5 }
  0x31   :  { %477 = shalt.err (!%p474_p9)
}
  0x32   :  { %48 = dma.hbm_to_vmem [thread:$0]  %s607_s3, 1024, %s43_s10, [#allocation6], %s507_s28, %s507_s28, %s508_s29  }
  0x33   :  { %500 = dma.done.wait [#allocation3], 64  }
  0x34   :  { %501 = vsyncadd [#allocation3], 4294967232 }
  0x35   :  { %502 = dma.done.wait [#allocation6], 2048  }
  0x36   :  { %503 = vsyncadd [#allocation6], 4294965248  ;;  %v511_v0 = vmov 0.0   ;;  %vm512_vm0 = vmmov 0   ;;  %v392_v1 = vld [vmem:[#allocation5] sm:$0xff]   ;;  %v393_v2 = vld [vmem:[#allocation5 + $0x8] sm:$0xff]  }
  0x37   :  { %344 = vmatprep.subr.bf16.mxu0 %v511_v0  ;;  %360 = vmatprep.mubr.msk.bf16.mxu0 %vm512_vm0, %v511_v0  ;;  %v394_v3 = vld [vmem:[#allocation5 + $0x10] sm:$0xff]   ;;  %v400_v4 = vld [vmem:[#allocation7] sm:$0xff]   ;;  %v395_v5 = vld [vmem:[#allocation5 + $0x18] sm:$0xff]  }
  0x38   :  { %364 = vmatprep.subr.bf16.mxu1 %v511_v0  ;;  %380 = vmatprep.mubr.msk.bf16.mxu1 %vm512_vm0, %v511_v0  ;;  %v401_v6 = vld [vmem:[#allocation7 + $0x8] sm:$0xff]   ;;  %v396_v7 = vld [vmem:[#allocation5 + $0x20] sm:$0xff]   ;;  %v402_v8 = vld [vmem:[#allocation7 + $0x10] sm:$0xff]  }
  0x39   :  { %345 = vmatpush3.bf16.msra.mxu0 %v392_v1  ;;  %365 = vmatpush3.bf16.msra.mxu1 %v400_v4  ;;  %v397_v9 = vld [vmem:[#allocation5 + $0x28] sm:$0xff]   ;;  %v403_v10 = vld [vmem:[#allocation7 + $0x18] sm:$0xff]   ;;  %v398_v11 = vld [vmem:[#allocation5 + $0x30] sm:$0xff]  }
  0x3a   :  { %346 = vmatprep.subr.bf16.mxu0 %v511_v0  ;;  %366 = vmatprep.subr.bf16.mxu1 %v511_v0  ;;  %v404_v12 = vld [vmem:[#allocation7 + $0x20] sm:$0xff]   ;;  %v399_v13 = vld [vmem:[#allocation5 + $0x38] sm:$0xff]   ;;  %v405_v14 = vld [vmem:[#allocation7 + $0x28] sm:$0xff]  }
  0x3b   :  { %v61_v15 = vld [vmem:[#allocation2] sm:$0xf]  ;;  %v406_v16 = vld [vmem:[#allocation7 + $0x30] sm:$0xff]  }
  0x3c   :  { %v407_v17 = vld [vmem:[#allocation7 + $0x38] sm:$0xff]  }
  0x3d   :  { %347 = vmatpush3.bf16.msra.mxu0 %v393_v2  ;;  %367 = vmatpush3.bf16.msra.mxu1 %v401_v6  ;;  %v308_v18 = vld [vmem:[%s606_s2] ss:$0 sm:$0xff]  ;;  %s513_s2 = smov [#allocation8]  }
  0x3e   :  { %348 = vmatprep.subr.bf16.mxu0 %v511_v0  ;;  %368 = vmatprep.subr.bf16.mxu1 %v511_v0  ;;  %v317_v26 = vld [vmem:[%s608_s4] ss:$0 sm:$0xff]  ;;  %s298_s7 = sshll.u32 %s513_s2, 4  ;;  %s299_s7 = int_to_ptr.vmem [resolvable:$true] %s298_s7 }
  0x3f   :  { %s478_s8 = scalar_lea.vmem %s299_s7, 128  ;;  %p483_p11 = scmp.lt.s32.totalorder %s299_s7, %s299_s7 }
  0x40   :  { %p479_p10 = scmp.ne.s32.totalorder %s299_s7, %s478_s8  ;;  %p484_p12 = scmp.lt.s32.totalorder %s478_s8, %s478_s8 }
  0x41   :  { %349 = vmatpush3.bf16.msra.mxu0 %v394_v3  ;;  %369 = vmatpush3.bf16.msra.mxu1 %v402_v8 }
  0x42   :  { %350 = vmatprep.subr.bf16.mxu0 %v511_v0  ;;  %370 = vmatprep.subr.bf16.mxu1 %v511_v0  ;;  %p485_p13 = por %p484_p12, %p483_p11 }
  0x44   :  { %p486_p0 = pnand %p485_p13, %p479_p10 }
  0x45   :  { %351 = vmatpush3.bf16.msra.mxu0 %v395_v5  ;;  %371 = vmatpush3.bf16.msra.mxu1 %v403_v10 }
  0x46   :  { %352 = vmatprep.subr.bf16.mxu0 %v511_v0  ;;  %372 = vmatprep.subr.bf16.mxu1 %v511_v0 }
  0x49   :  { %353 = vmatpush3.bf16.msra.mxu0 %v396_v7  ;;  %373 = vmatpush3.bf16.msra.mxu1 %v404_v12 }
  0x4a   :  { %354 = vmatprep.subr.bf16.mxu0 %v511_v0  ;;  %374 = vmatprep.subr.bf16.mxu1 %v511_v0 }
  0x4d   :  { %355 = vmatpush3.bf16.msra.mxu0 %v397_v9  ;;  %375 = vmatpush3.bf16.msra.mxu1 %v405_v14 }
  0x4e   :  { %356 = vmatprep.subr.bf16.mxu0 %v511_v0  ;;  %376 = vmatprep.subr.bf16.mxu1 %v511_v0 }
  0x51   :  { %357 = vmatpush3.bf16.msra.mxu0 %v398_v11  ;;  %377 = vmatpush3.bf16.msra.mxu1 %v406_v16 }
  0x52   :  { %358 = vmatprep.subr.bf16.mxu0 %v511_v0  ;;  %378 = vmatprep.subr.bf16.mxu1 %v511_v0 }
  0x55   :  { %359 = vmatpush3.bf16.msra.mxu0 %v399_v13  ;;  %379 = vmatpush3.bf16.msra.mxu1 %v407_v17 }
  0x58   :  { %361 = vmatmul.mubr.bf16.vlgmr.msra.gmra.mrb[0].mxu0 %v61_v15 }
 0x12b   :  { %v167_v19 = vpop.f32.mrb[0].mxu0 }
 0x12c   :  { %v168_v20 = vadd.f32 %v308_v18, %v167_v19  ;;  %v362_v21 = vpop.f32.mrb[1].mxu0 }
 0x12d   :  { %v170_v22 = vpop.f32.mrb[2].mxu0 }
 0x12e   :  { %v173_v23 = vmax.f32 %v168_v20, 0.0  ;;  %v363_v24 = vpop.f32.mrb[3].mxu0 }
 0x130   :  { %v174_v25 = vpack.c.bf16 %v173_v23, %v173_v23 }
 0x132   :  { %381 = vmatmul.mubr.bf16.vlgmr.msra.gmra.mrb[0].mxu1 %v174_v25 }
 0x205   :  { %v280_v27 = vpop.f32.mrb[0].mxu1 }
 0x206   :  { %v281_v28 = vadd.f32 %v317_v26, %v280_v27  ;;  %v382_v29 = vpop.f32.mrb[1].mxu1 }
 0x207   :  { %v283_v30 = vpop.f32.mrb[2].mxu1 }
 0x208   :  { %v286_v31 = vsub.f32 0.0, %v281_v28  ;;  %v383_v32 = vpop.f32.mrb[3].mxu1 }
 0x20a   :  { %v287_v33 = vmul.f32 1.442695, %v286_v31 }
 0x20c   :  { %408 = vpow2.f32 %v287_v33 }
 0x216   :  { %v409_v34 = vpop.eup %408 }
 0x217   :  { %v289_v35 = vadd.f32 1.0, %v409_v34 }
 0x219   :  { %410 = vrcp.f32 %v289_v35 }
 0x223   :  { %v411_v36 = vpop.eup %410 }
 0x224   :  { %291 = vst [vmem:[#allocation8] sm:$0xff] %v411_v36 }
 0x225   :  { %489 = shalt.err (!%p486_p0)
}
 0x226   :  { %s490_s10 = scalar_lea.hbm %s609_s5, 128 }
 0x227   :  { %p491_p1 = scmp.ne.s32.totalorder %s609_s5, %s490_s10  ;;  %p494_p2 = scmp.lt.u32.totalorder %s490_s10, %s609_s5 }
 0x229   :  { %p496_p3 = pnand %p494_p2, %p491_p1 }
 0x22b   :  { %499 = shalt.err (!%p496_p3)
}
 0x22c   :  { %301 = dma.vmem_to_hbm [thread:$0]  %s299_s7, 128, %s609_s5, [#allocation4]  }
 0x22d   :  { %504 = dma.done.wait [#allocation4], 128  }
 0x22e   :  { %505 = vsyncadd [#allocation4], 4294967168 }
 0x22f   :  { %305 = vsyncpa [#allocation3], 1 }
 0x230   :  { %306 = vsyncpa [#allocation6], 1 }
 0x231   :  { %307 = vsyncpa [#allocation4], 1 }

</bundles_post_ra>
